<compile_context>
chip_gen: v7x
topology: tpu7x:2x2x1
jax: 0.10.0
libtpu: 0.0.40
codegen_flags: <defaults>
</compile_context>

<pallas_src>
import math

import numpy as np

import jax
import jax.numpy as jnp
from jax.experimental import pallas as pl
from jax.experimental.pallas import tpu as pltpu


def _round_up(x: int, m: int) -> int:
    return (x + m - 1) // m * m


def _cdiv(a: int, b: int) -> int:
    return (a + b - 1) // b


def _sinusoidal_kernel(time_ref, tbl_ref, out_ref):
    # time_ref : (tb, 1)   f32 -- timesteps for this row tile (column vector)
    # tbl_ref  : (3, dim)  f32 -- row 0: interleaved freqs [f0, f0, f1, f1, ...]
    #                             row 1: sin weight        [ 1,  0,  1,  0, ...]
    #                             row 2: cos weight        [ 0,  1,  0,  1, ...]
    # out_ref  : (tb, dim)
    t = time_ref[...]                        # (tb, 1)
    freq = tbl_ref[0:1, :]                   # (1, dim) static ref slices (free views)
    sin_w = tbl_ref[1:2, :]
    cos_w = tbl_ref[2:3, :]
    emb = t * freq                           # (tb, dim) VPU broadcast multiply
    out_ref[...] = (sin_w * jnp.sin(emb) + cos_w * jnp.cos(emb)).astype(out_ref.dtype)


def sinusoidal_positional_embeddings(time: jax.Array, dim: int,
                                     out_dtype=jnp.float32) -> jax.Array:
    """time: [B] (any float/int dtype). Returns [B, dim], matching the PyTorch
    module: out[:, 0::2] = sin(t * f), out[:, 1::2] = cos(t * f),
    f[k] = exp(-k * log(10000) / (dim//2 - 1)).
    out_dtype lets callers request bf16 output (halves store HBM bytes); default
    float32 to match the reference module."""
    assert dim % 2 == 0 and dim >= 4, "dim must be even and >= 4"
    B = int(time.shape[0])
    half_dim = dim // 2

    # ---- trace-time constant table: pure function of dim ----------------------
    scale = math.log(10000.0) / (half_dim - 1)
    freq_half = np.exp(-scale * np.arange(half_dim, dtype=np.float32))  # (half_dim,)
    tbl = np.zeros((3, dim), np.float32)
    tbl[0] = np.repeat(freq_half, 2)        # interleaved frequencies
    tbl[1, 0::2] = 1.0                      # sin weight on even columns
    tbl[2, 1::2] = 1.0                      # cos weight on odd columns

    # ---- row tiling ------------------------------------------------------------
    # Multiple of 8 rows. Budget ~16 MiB VMEM for the double-buffered output tile
    # plus the lane-padded (tb, 1) time tile (512 B/row in VMEM), and cap tb so the
    # grid has >= 2 steps whenever B > 8 (lets "parallel" use both v7x TensorCores).
    out_itemsize = jnp.dtype(out_dtype).itemsize
    vmem_bytes_per_row = 2 * dim * out_itemsize + 2 * 512
    max_rows = max(8, ((16 * 1024 * 1024) // vmem_bytes_per_row) // 8 * 8)
    tb = max(8, min(max_rows, _round_up(_cdiv(B, 2), 8)))
    grid = _cdiv(B, tb)                      # ragged last block masked by Pallas

    time_col = time.astype(jnp.float32).reshape(B, 1)

    cost = pl.CostEstimate(
        flops=6 * B * dim,
        transcendentals=2 * B * dim,
        bytes_accessed=4 * B + 4 * 3 * dim + B * dim * out_itemsize,
    )

    return pl.pallas_call(
        _sinusoidal_kernel,
        out_shape=jax.ShapeDtypeStruct((B, dim), out_dtype),
        grid=(grid,),
        in_specs=[
            pl.BlockSpec((tb, 1), lambda i: (i, 0)),    # timesteps, tiled over rows
            pl.BlockSpec((3, dim), lambda i: (0, 0)),   # constant table, resident
        ],
        out_specs=pl.BlockSpec((tb, dim), lambda i: (i, 0)),
        compiler_params=pltpu.CompilerParams(
            dimension_semantics=("parallel",)),         # independent row tiles
        cost_estimate=cost,
    )(time_col, jnp.asarray(tbl))


def _reference(time, dim):
    half_dim = dim // 2
    scale = math.log(10000.0) / (half_dim - 1)
    freq = jnp.exp(jnp.arange(half_dim, dtype=jnp.float32) * -scale)
    emb = time.astype(jnp.float32)[:, None] * freq[None, :]
    out = jnp.zeros((time.shape[0], dim), jnp.float32)
    out = out.at[:, 0::2].set(jnp.sin(emb))
    out = out.at[:, 1::2].set(jnp.cos(emb))
    return out


if __name__ == "__main__":
    key = jax.random.PRNGKey(0)
    B, dim = 8, 32
    # diffusion-style timesteps
    time = jax.random.uniform(key, (B,), jnp.float32, minval=0.0, maxval=1000.0)

    out = jax.block_until_ready(sinusoidal_positional_embeddings(time, dim))
    ref = _reference(time, dim)

    assert out.shape == (B, dim) and out.dtype == jnp.float32
    max_err = float(jnp.max(jnp.abs(out - ref)))
    assert jnp.allclose(out, ref, atol=1e-4, rtol=1e-4), max_err

    print("KERNEL_OK")
</pallas_src>

<mosaic_0001>
module attributes {stable_mosaic.version = 11 : i64} {
  func.func @_sinusoidal_kernel(%arg0: i32, %arg1: memref<8x1xf32, #tpu.memory_space<vmem>>, %arg2: memref<3x32xf32, #tpu.memory_space<vmem>>, %arg3: memref<8x32xf32, #tpu.memory_space<vmem>>) attributes {dimension_semantics = [#tpu.dimension_semantics<parallel>], iteration_bounds = array<i64: 1>, scalar_prefetch = 0 : i64, scratch_operands = 0 : i64, tpu.core_type = #tpu.core_type<tc>, window_params = [{transform_indices = @transform_0, window_bounds = array<i64: 8, 1>}, {pipeline_mode = #tpu.pipeline_mode<synchronous>, transform_indices = @transform_1, window_bounds = array<i64: 3, 32>}, {transform_indices = @transform_2, window_bounds = array<i64: 8, 32>}]} {
    %c0 = arith.constant 0 : index
    %c0_0 = arith.constant 0 : index
    %0 = vector.load %arg1[%c0, %c0_0] : memref<8x1xf32, #tpu.memory_space<vmem>>, vector<8x1xf32>
    %c0_1 = arith.constant 0 : index
    %c0_2 = arith.constant 0 : index
    %1 = vector.load %arg2[%c0_1, %c0_2] : memref<3x32xf32, #tpu.memory_space<vmem>>, vector<1x32xf32>
    %c1 = arith.constant 1 : index
    %c0_3 = arith.constant 0 : index
    %2 = vector.load %arg2[%c1, %c0_3] : memref<3x32xf32, #tpu.memory_space<vmem>>, vector<1x32xf32>
    %c2 = arith.constant 2 : index
    %c0_4 = arith.constant 0 : index
    %3 = vector.load %arg2[%c2, %c0_4] : memref<3x32xf32, #tpu.memory_space<vmem>>, vector<1x32xf32>
    %4 = vector.broadcast %0 : vector<8x1xf32> to vector<8x32xf32>
    %5 = vector.broadcast %1 : vector<1x32xf32> to vector<8x32xf32>
    %6 = arith.mulf %4, %5 : vector<8x32xf32>
    %7 = math.sin %6 : vector<8x32xf32>
    %8 = vector.broadcast %2 : vector<1x32xf32> to vector<8x32xf32>
    %9 = arith.mulf %8, %7 : vector<8x32xf32>
    %10 = math.cos %6 : vector<8x32xf32>
    %11 = vector.broadcast %3 : vector<1x32xf32> to vector<8x32xf32>
    %12 = arith.mulf %11, %10 : vector<8x32xf32>
    %13 = arith.addf %9, %12 : vector<8x32xf32>
    %c0_5 = arith.constant 0 : index
    %c0_6 = arith.constant 0 : index
    %14 = vector.load %arg3[%c0_5, %c0_6] : memref<8x32xf32, #tpu.memory_space<vmem>>, vector<8x32xf32>
    tpu.vector_store %arg3[%c0_5, %c0_6], %13 {strides = array<i32>} : memref<8x32xf32, #tpu.memory_space<vmem>>, vector<8x32xf32>,
    return
  }
  func.func @transform_0(%arg0: i32) -> (i32, i32) {
    %c0_i32 = arith.constant 0 : i32
    %c0_i32_0 = arith.constant 0 : i32
    return %arg0, %c0_i32 : i32, i32
  }
  func.func @transform_1(%arg0: i32) -> (i32, i32) {
    %c0_i32 = arith.constant 0 : i32
    %c0_i32_0 = arith.constant 0 : i32
    %c0_i32_1 = arith.constant 0 : i32
    return %c0_i32, %c0_i32_0 : i32, i32
  }
  func.func @transform_2(%arg0: i32) -> (i32, i32) {
    %c0_i32 = arith.constant 0 : i32
    %c0_i32_0 = arith.constant 0 : i32
    return %arg0, %c0_i32 : i32, i32
  }
}

</mosaic_0001>

<bundles_post_ra>
// kernel: tpu_custom_call.1
= control target key start
LH: loop header
LB: loop body
LE: loop exit
PB: predicated region body
PF: predicated region fallthrough
CT: control target
= control target key end

     0   :  { %v312_v1 = vmov 0   ;;  %s380_s0 = inlined_call_operand.vmem [shape: f32[8,1], index: 0, kind: input, shape index: {}]   ;;  %s381_s1 = inlined_call_operand.vmem [shape: f32[3,32], index: 1, kind: input, shape index: {}]   ;;  %s382_s2 = inlined_call_operand.hbm [shape: f32[8,32], index: 2, kind: output, shape index: {}]  }
   0x1   :  { %v12_v0 = vld [vmem:[%s380_s0] sm:$0xff]  ;;  %283 = vset.pattern.permute.xlu0 %v312_v1 }
   0x2   :  { %18 = vperm.xlu0 %283, %v12_v0  }
   0x3   :  { %7 = vsyncpa [#allocation3], 0  ;;  %v260_v2 = vld [vmem:[%s381_s1] ss:$0 sm:$0xff]  ;;  %v313_v15 = vmov 683565275  }
   0x4   :  { %v314_v17 = vmov 2475754826   ;;  %v315_v20 = vmov 2131351028   ;;  %v316_v23 = vmov 2102212464  }
   0x5   :  { %v317_v26 = vmov 920167782   ;;  %v318_v29 = vmov 1326507024   ;;  %s319_s16 = smov [#allocation2]  }
   0x6   :  { %s252_s17 = sshll.u32 %s319_s16, 4  ;;  %s253_s17 = int_to_ptr.vmem [resolvable:$true] %s252_s17 }
   0x7   :  { %s288_s18 = scalar_lea.vmem %s253_s17, 128  ;;  %p293_p1 = scmp.lt.s32.totalorder %s253_s17, %s253_s17 }
   0x8   :  { %p289_p0 = scmp.ne.s32.totalorder %s253_s17, %s288_s18  ;;  %p294_p2 = scmp.lt.s32.totalorder %s288_s18, %s288_s18 }
   0xa   :  { %p295_p3 = por %p294_p2, %p293_p1 }
   0xc   :  { %p296_p4 = pnand %p295_p3, %p289_p0 }
  0x81   :  { %v19_v3 = vpop.permute.xlu0 %18 }
  0x82   :  { %v341_v4 = vmul.f32 %v260_v2, %v19_v3 }
  0x84   :  { %v29_v5 = vand.u32 2139095040, %v341_v4  ;;  %v26_v9 = vand.u32 2147483647, %v341_v4  ;;  %vm28_vm7 = vcmp.lt.s32.totalorder %v341_v4, 0  ;;  %vm118_vm15 = vweird.f32 %v341_v4 }
  0x86   :  { %v30_v6 = vshrl.u32 %v29_v5, 23  ;;  %v33_v12 = vand.u32 8388607, %v26_v9  ;;  %vm27_vm8 = vcmp.le.f32.partialorder %v26_v9, 0.7853982 }
  0x88   :  { %v261_v7 = vadd.s32 4294967169, %v30_v6  ;;  %v34_v31 = vor.u32 8388608, %v33_v12 }
  0x8a   :  { %v36_v8 = vadd.s32 1, %v261_v7  ;;  %v74_v45 = vshll.u32 %v34_v31, 8 }
  0x8c   :  { %vm37_vm0 = vcmp.gt.s32.totalorder %v36_v8, 0 }
  0x8d   :  { %v38_v10 = vsel %vm37_vm0, %v36_v8, 0  ;;  %vm244_vm0 = vcmask 261120  }
  0x8e   :  { %v40_v11 = vand.u32 31, %v38_v10  ;;  %v39_v14 = vshrl.u32 %v38_v10, 5 }
  0x90   :  { %v41_v13 = vsub.s32 32, %v40_v11  ;;  %v43_v16 = vshll.u32 %v313_v15, %v40_v11  ;;  %v46_v18 = vshll.u32 %v314_v17, %v40_v11  ;;  %v49_v22 = vshll.u32 %v315_v20, %v40_v11 }
  0x91   :  { %v52_v25 = vshll.u32 %v316_v23, %v40_v11  ;;  %v55_v28 = vshll.u32 %v317_v26, %v40_v11  ;;  %vm58_vm1 = vcmp.lt.s32.totalorder %v39_v14, 1  ;;  %vm61_vm2 = vcmp.lt.s32.totalorder %v39_v14, 4 }
  0x92   :  { %v44_v19 = vshrl.u32 %v314_v17, %v41_v13  ;;  %v47_v21 = vshrl.u32 %v315_v20, %v41_v13  ;;  %v50_v24 = vshrl.u32 %v316_v23, %v41_v13  ;;  %v53_v27 = vshrl.u32 %v317_v26, %v41_v13 }
  0x93   :  { %v56_v30 = vshrl.u32 %v318_v29, %v41_v13  ;;  %v42_v40 = vshrl.u32 %v313_v15, %v41_v13  ;;  %vm60_vm3 = vcmp.lt.s32.totalorder %v39_v14, 3  ;;  %vm59_vm4 = vcmp.lt.s32.totalorder %v39_v14, 2 }
  0x94   :  { %v45_v32 = vor.u32 %v44_v19, %v43_v16  ;;  %v48_v33 = vor.u32 %v47_v21, %v46_v18  ;;  %v51_v34 = vor.u32 %v50_v24, %v49_v22  ;;  %v54_v35 = vor.u32 %v53_v27, %v52_v25 }
  0x95   :  { %v57_v36 = vor.u32 %v56_v30, %v55_v28 }
  0x96   :  { %v63_v37 = vsel %vm61_vm2, %v51_v34, 2102212464  ;;  %v66_v38 = vsel %vm58_vm1, %v45_v32, %v48_v33  ;;  %v70_v39 = vsel %vm58_vm1, %v48_v33, %v51_v34  ;;  %v67_v41 = vsel %vm61_vm2, %v54_v35, 920167782 }
  0x97   :  { %v71_v42 = vsel %vm61_vm2, %v57_v36, 1326507024  ;;  %v68_v43 = vsel %vm60_vm3, %v51_v34, %v67_v41  ;;  %v62_v46 = vsel %vm58_vm1, %v42_v40, %v45_v32  ;;  %v64_v47 = vsel %vm60_vm3, %v48_v33, %v63_v37  ;;  %v265_v32 = vld [vmem:[%s381_s1 + $0x1] ss:$0 sm:$0xff]  ;;  %v270_v33 = vld [vmem:[%s381_s1 + $0x2] ss:$0 sm:$0xff] }
  0x98   :  { %v72_v44 = vsel %vm60_vm3, %v54_v35, %v71_v42  ;;  %v69_v48 = vsel %vm59_vm4, %v66_v38, %v68_v43  ;;  %v65_v54 = vsel %vm59_vm4, %v62_v46, %v64_v47 }
  0x99   :  { %v73_v49 = vsel %vm59_vm4, %v70_v39, %v72_v44  ;;  %v350_v52 = vmul.u32.u64.low %v74_v45, %v69_v48  ;;  %v351_v53 = vmul.u32.u64.high %v74_v45, %v69_v48, %v350_v52  ;;  %v81_v56 = vmul.u32 %v74_v45, %v65_v54 }
  0x9a   :  { %v347_v50 = vmul.u32.u64.low %v74_v45, %v73_v49  ;;  %v348_v51 = vmul.u32.u64.high %v74_v45, %v73_v49, %v347_v50 }
  0x9b   :  { %v84_v55 = vadd.s32 1, %v351_v53 }
  0x9c   :  { %vm83_vm5 = vc.u32 %v348_v51, %v350_v52  ;;  %v82_v5 = vadd.s32 %v350_v52, %v348_v51 }
  0x9d   :  { %v85_v57 = vsel %vm83_vm5, %v84_v55, %v351_v53 }
  0x9e   :  { %v86_v58 = vadd.s32 %v85_v57, %v81_v56 }
  0xa0   :  { %v87_v59 = vadd.s32 536870912, %v86_v58 }
  0xa2   :  { %v88_v60 = vshrl.u32 %v87_v59, 30 }
  0xa4   :  { %v89_v61 = vshll.u32 %v88_v60, 30  ;;  %v112_v18 = vsub.s32 4, %v88_v60 }
  0xa6   :  { %v90_v62 = vsub.s32 %v86_v58, %v89_v61  ;;  %v113_v21 = vsel %vm28_vm7, %v112_v18, %v88_v60 }
  0xa7   :  { %v115_v23 = vsel %vm27_vm8, 0, %v113_v21 }
  0xa8   :  { %v92_v63 = vsub.s32 0, %v90_v62  ;;  %v119_v24 = vadd.s32 3, %v115_v23  ;;  %v228_v26 = vand.u32 3, %v115_v23 }
  0xaa   :  { %v262_v0 = vmin.u32 %v92_v63, %v90_v62  ;;  %v120_v25 = vand.u32 3, %v119_v24  ;;  %vm233_vm10 = vcmp.eq.s32.totalorder %v228_v26, 2  ;;  %vm230_vm12 = vcmp.eq.s32.totalorder %v228_v26, 0 }
  0xab   :  { %vm229_vm14 = vcmp.lt.s32.totalorder %v228_v26, 2 }
  0xac   :  { %v94_v1 = vclz %v262_v0  ;;  %vm125_vm9 = vcmp.eq.s32.totalorder %v120_v25, 2  ;;  %vm122_vm11 = vcmp.eq.s32.totalorder %v120_v25, 0  ;;  %vm121_vm13 = vcmp.lt.s32.totalorder %v120_v25, 2 }
  0xae   :  { %v263_v2 = vadd.s32 4294967294, %v94_v1 }
  0xb0   :  { %vm264_vm6 = vcmp.lt.s32.totalorder %v263_v2, 0 }
  0xb1   :  { %v97_v3 = vsel %vm264_vm6, 0, %v263_v2 }
  0xb2   :  { %v98_v6 = vsub.s32 32, %v97_v3  ;;  %v102_v7 = vsub.s32 4294967266, %v97_v3  ;;  %v99_v8 = vshll.u32 %v90_v62, %v97_v3 }
  0xb4   :  { %v100_v10 = vshrl.u32 %v82_v5, %v98_v6  ;;  %v103_v11 = vadd.s32 127, %v102_v7 }
  0xb6   :  { %v101_v12 = vor.u32 %v100_v10, %v99_v8  ;;  %v104_v13 = vshll.u32 %v103_v11, 23 }
  0xb8   :  { %v105_v14 = vor.u32 4788187, %v104_v13  ;;  %v108_v16 = vcvt.s32.f32 %v101_v12 }
  0xba   :  { %v106_v15 = vand.u32 2147483647, %v105_v14 }
  0xbc   :  { %v109_v17 = vmul.f32 %v108_v16, %v106_v15 }
  0xbe   :  { %v110_v19 = vxor.u32 2147483648, %v109_v17 }
  0xc0   :  { %v111_v20 = vsel %vm28_vm7, %v110_v19, %v109_v17 }
  0xc1   :  { %v114_v22 = vsel %vm27_vm8, %v341_v4, %v111_v20 }
  0xc2   :  { %284 = vcosq.f32 %v114_v22 }
  0xc3   :  { %286 = vsinq.f32 %v114_v22 }
  0xcc   :  { %v285_v27 = vpop.eup %284 }
  0xcd   :  { %v287_v28 = vpop.eup %286  ;;  %v126_v29 = vxor.u32 2147483648, %v285_v27 }
  0xce   :  { %v123_v30 = vxor.u32 2147483648, %v287_v28 }
  0xcf   :  { %v127_v31 = vsel %vm125_vm9, %v126_v29, %v287_v28  ;;  %v235_v9 = vsel %vm233_vm10, %v126_v29, %v287_v28 }
  0xd0   :  { %v124_v34 = vsel %vm122_vm11, %v285_v27, %v123_v30  ;;  %v232_v35 = vsel %vm230_vm12, %v285_v27, %v123_v30 }
  0xd1   :  { %v128_v36 = vsel %vm121_vm13, %v124_v34, %v127_v31  ;;  %v236_v37 = vsel %vm229_vm14, %v232_v35, %v235_v9 }
  0xd2   :  { %v129_v38 = vsel %vm118_vm15, nan, %v128_v36  ;;  %v237_v39 = vsel %vm118_vm15, nan, %v236_v37 }
  0xd3   :  { %v134_v40 = vmul.f32 %v265_v32, %v129_v38  ;;  %v242_v41 = vmul.f32 %v270_v33, %v237_v39 }
  0xd5   :  { %v243_v42 = vadd.f32 %v242_v41, %v134_v40 }
  0xd7   :  { %245 = vst.msk [vmem:[#allocation2] sm:$0xff] %vm244_vm0, %v243_v42 }
  0xd8   :  { %299 = shalt.err (!%p296_p4)
}
  0xd9   :  { %s300_s20 = scalar_lea.hbm %s382_s2, 128 }
  0xda   :  { %p301_p5 = scmp.ne.s32.totalorder %s382_s2, %s300_s20  ;;  %p304_p6 = scmp.lt.u32.totalorder %s300_s20, %s382_s2 }
  0xdc   :  { %p306_p7 = pnand %p304_p6, %p301_p5 }
  0xde   :  { %309 = shalt.err (!%p306_p7)
}
  0xdf   :  { %255 = dma.vmem_to_hbm [thread:$0]  %s253_s17, 128, %s382_s2, [#allocation3]  }
  0xe0   :  { %310 = dma.done.wait [#allocation3], 128  }
  0xe1   :  { %311 = vsyncadd [#allocation3], 4294967168 }
  0xe2   :  { %259 = vsyncpa [#allocation3], 1 }

</bundles_post_ra>
